<compile_context>
chip_gen: v7x
topology: tpu7x:2x2x1
jax: 0.10.0
libtpu: 0.0.40
codegen_flags: <defaults>
</compile_context>

<pallas_src>
import jax
import jax.numpy as jnp
from jax.experimental import pallas as pl
from jax.experimental.pallas import tpu as pltpu

LANE = 128
NEG_BIG = -1e30  # bias for padded action columns -> exp() underflows to 0


def _round_up(x, m):
    return ((x + m - 1) // m) * m


def actor_kernel(x_ref, w1_ref, b1_ref, w2_ref, b2_ref, w3_ref, b3_ref, out_ref):
    # Input tile arrives as raw f32 (no wrapper-side pad/cast pass); cast to
    # bf16 just before the MXU.  Accumulate + elementwise math in f32.
    x = x_ref[...].astype(jnp.bfloat16)

    # Linear 1 + ReLU
    h1 = jnp.dot(x, w1_ref[...], preferred_element_type=jnp.float32) + b1_ref[...]
    h1 = jnp.maximum(h1, 0.0).astype(jnp.bfloat16)

    # Linear 2 + ReLU
    h2 = jnp.dot(h1, w2_ref[...], preferred_element_type=jnp.float32) + b2_ref[...]
    h2 = jnp.maximum(h2, 0.0).astype(jnp.bfloat16)

    # Linear 3 (logits).  Padded action columns carry a -1e30 bias, so they
    # never contaminate the softmax max / denominator.
    logits = jnp.dot(h2, w3_ref[...], preferred_element_type=jnp.float32) + b3_ref[...]

    # Numerically-stable softmax over the last (lane) axis.  Exact division
    # (not approx reciprocal): downstream PPO ratio/entropy math, and the
    # kernel is HBM-bound so the EUP cost is hidden anyway.
    m = jnp.max(logits, axis=-1, keepdims=True)
    e = jnp.exp(logits - m)
    denom = jnp.sum(e, axis=-1, keepdims=True)
    out_ref[...] = (e / denom).astype(out_ref.dtype)


def actor_forward(state, padded_params, *, tile_b=2048, trim_actions=True):
    """state: [B, state_dim] f32 (unpadded).  padded_params: prepare_padded_params output.

    Returns bf16 probabilities.  With trim_actions=True (default) the result is
    [B, action_dim] (module semantics); with False the lane-padded [B, Ap]
    buffer is returned so a fused consumer can index columns lazily and skip
    the strided column-slice pass.
    """
    w1, b1 = padded_params["w1"], padded_params["b1"]
    w2, b2 = padded_params["w2"], padded_params["b2"]
    w3, b3 = padded_params["w3"], padded_params["b3"]
    action_dim = padded_params["action_dim"]

    B, S = state.shape
    assert S == w1.shape[0], "state_dim mismatch with prepared params"
    Ap = w3.shape[1]  # padded action dim (lane multiple)

    # Cap tile_b so the grid has >= 2 steps (v7x megacore sharding); harmless on
    # v5e/v6e.  tile_b must be a sublane multiple (8).
    max_tile = _round_up(max(1, -(-B // 2)), 8)
    tile_b = max(8, min(tile_b, max_tile))
    grid = (pl.cdiv(B, tile_b),)  # partial last block is write-masked by Pallas

    const = lambda a: pl.BlockSpec(a.shape, lambda i: (0, 0))  # VMEM-resident

    probs = pl.pallas_call(
        actor_kernel,
        out_shape=jax.ShapeDtypeStruct((B, Ap), jnp.bfloat16),
        grid=grid,
        in_specs=[
            # last dim == full array dim -> legal block even though S < 128
            pl.BlockSpec((tile_b, S), lambda i: (i, 0)),
            const(w1), const(b1),
            const(w2), const(b2),
            const(w3), const(b3),
        ],
        out_specs=pl.BlockSpec((tile_b, Ap), lambda i: (i, 0)),
        compiler_params=pltpu.CompilerParams(
            # Batch tiles are independent -> shard across v7x's 2 TensorCores.
            dimension_semantics=("parallel",),
        ),
    )(state, w1, b1, w2, b2, w3, b3)

    if trim_actions:
        probs = probs[:, :action_dim]
    return probs


def init_actor_params(key, state_dim, hidden_dim, action_dim):
    """PyTorch-default-like Linear init (uniform +-1/sqrt(fan_in)); (in, out) f32."""
    ks = jax.random.split(key, 6)

    def lin(kw, kb, fan_in, fan_out):
        bound = 1.0 / jnp.sqrt(jnp.float32(fan_in))
        w = jax.random.uniform(kw, (fan_in, fan_out), jnp.float32, -bound, bound)
        b = jax.random.uniform(kb, (1, fan_out), jnp.float32, -bound, bound)
        return w, b

    w1, b1 = lin(ks[0], ks[1], state_dim, hidden_dim)
    w2, b2 = lin(ks[2], ks[3], hidden_dim, hidden_dim)
    w3, b3 = lin(ks[4], ks[5], hidden_dim, action_dim)
    return {"w1": w1, "b1": b1, "w2": w2, "b2": b2, "w3": w3, "b3": b3}


def prepare_padded_params(params, state_dim, hidden_dim, action_dim):
    """Pad hidden/action axes to 128 lanes; weights -> bf16, biases -> f32.
    w1 keeps only the real state_dim rows (the state is NOT padded at runtime).
    Padded action-bias columns are -1e30 to mask them out of the softmax."""
    Hp = _round_up(hidden_dim, LANE)
    Ap = _round_up(action_dim, LANE)

    def pad_w(w, rows, cols):
        return jnp.pad(w, ((0, rows - w.shape[0]),
                           (0, cols - w.shape[1]))).astype(jnp.bfloat16)

    def pad_b(b, cols, fill=0.0):
        return jnp.pad(b, ((0, 0), (0, cols - b.shape[1])),
                       constant_values=fill).astype(jnp.float32)

    return {
        "w1": pad_w(params["w1"], state_dim, Hp), "b1": pad_b(params["b1"], Hp),
        "w2": pad_w(params["w2"], Hp, Hp),        "b2": pad_b(params["b2"], Hp),
        "w3": pad_w(params["w3"], Hp, Ap),        "b3": pad_b(params["b3"], Ap, fill=NEG_BIG),
        "action_dim": action_dim,
    }


if __name__ == "__main__":
    key = jax.random.PRNGKey(0)
    k_state, k_params, k_big = jax.random.split(key, 3)

    batch, state_dim, hidden_dim, action_dim = 8, 16, 32, 8

    raw = init_actor_params(k_params, state_dim, hidden_dim, action_dim)
    padded = prepare_padded_params(raw, state_dim, hidden_dim, action_dim)

    def ref(x, p):  # pure-f32 JAX reference (matches the PyTorch forward)
        h1 = jnp.maximum(x @ p["w1"] + p["b1"], 0.0)
        h2 = jnp.maximum(h1 @ p["w2"] + p["b2"], 0.0)
        return jax.nn.softmax(h2 @ p["w3"] + p["b3"], axis=-1)

    # Small batch (typical single-env inference shape).
    state = jax.random.normal(k_state, (batch, state_dim), jnp.float32)
    probs = jax.block_until_ready(actor_forward(state, padded)).astype(jnp.float32)
    expected = ref(state, raw)
    assert probs.shape == (batch, action_dim)
    assert jnp.allclose(jnp.sum(probs, axis=-1), 1.0, atol=1e-2)
    # bf16 matmuls + bf16 output -> relaxed tolerance vs f32 reference.
    assert jnp.allclose(probs, expected, atol=2.5e-2, rtol=2.5e-2)

    # Larger batch: exercises the multi-step batch grid (tile cap -> >=2 steps)
    # and the write-masked partial last block (300 rows, tile of 152).
    big_state = jax.random.normal(k_big, (300, state_dim), jnp.float32)
    big_probs = jax.block_until_ready(actor_forward(big_state, padded)).astype(jnp.float32)
    big_expected = ref(big_state, raw)
    assert big_probs.shape == (300, action_dim)
    assert jnp.allclose(jnp.sum(big_probs, axis=-1), 1.0, atol=1e-2)
    assert jnp.allclose(big_probs, big_expected, atol=2.5e-2, rtol=2.5e-2)

    # Lazy-consumer path: padded buffer, column slice deferred to the caller.
    full = jax.block_until_ready(actor_forward(big_state, padded, trim_actions=False))
    assert full.shape[1] % LANE == 0
    assert jnp.allclose(full[:, :action_dim].astype(jnp.float32), big_probs)

    print("KERNEL_OK")
</pallas_src>

<mosaic_0001>
module attributes {stable_mosaic.version = 11 : i64} {
  func.func @actor_kernel(%arg0: i32, %arg1: memref<8x16xf32, #tpu.memory_space<vmem>>, %arg2: memref<16x128xbf16, #tpu.memory_space<vmem>>, %arg3: memref<1x128xf32, #tpu.memory_space<vmem>>, %arg4: memref<128x128xbf16, #tpu.memory_space<vmem>>, %arg5: memref<1x128xf32, #tpu.memory_space<vmem>>, %arg6: memref<128x128xbf16, #tpu.memory_space<vmem>>, %arg7: memref<1x128xf32, #tpu.memory_space<vmem>>, %arg8: memref<8x128xbf16, #tpu.memory_space<vmem>>) attributes {dimension_semantics = [#tpu.dimension_semantics<parallel>], iteration_bounds = array<i64: 1>, scalar_prefetch = 0 : i64, scratch_operands = 0 : i64, tpu.core_type = #tpu.core_type<tc>, window_params = [{transform_indices = @transform_0, window_bounds = array<i64: 8, 16>}, {pipeline_mode = #tpu.pipeline_mode<synchronous>, transform_indices = @transform_1, window_bounds = array<i64: 16, 128>}, {pipeline_mode = #tpu.pipeline_mode<synchronous>, transform_indices = @transform_2, window_bounds = array<i64: 1, 128>}, {pipeline_mode = #tpu.pipeline_mode<synchronous>, transform_indices = @transform_3, window_bounds = array<i64: 128, 128>}, {pipeline_mode = #tpu.pipeline_mode<synchronous>, transform_indices = @transform_4, window_bounds = array<i64: 1, 128>}, {pipeline_mode = #tpu.pipeline_mode<synchronous>, transform_indices = @transform_5, window_bounds = array<i64: 128, 128>}, {pipeline_mode = #tpu.pipeline_mode<synchronous>, transform_indices = @transform_6, window_bounds = array<i64: 1, 128>}, {transform_indices = @transform_7, window_bounds = array<i64: 8, 128>}]} {
    %c0 = arith.constant 0 : index
    %c0_0 = arith.constant 0 : index
    %0 = vector.load %arg1[%c0, %c0_0] : memref<8x16xf32, #tpu.memory_space<vmem>>, vector<8x16xf32>
    %1 = arith.truncf %0 : vector<8x16xf32> to vector<8x16xbf16>
    %c0_1 = arith.constant 0 : index
    %c0_2 = arith.constant 0 : index
    %2 = vector.load %arg2[%c0_1, %c0_2] : memref<16x128xbf16, #tpu.memory_space<vmem>>, vector<16x128xbf16>
    %cst = arith.constant dense<0.000000e+00> : vector<8x128xf32>
    %3 = tpu.matmul %1, %2, %cst {dimension_numbers = #tpu.dot_dimension_numbers<[1], [0], [0], [1], [0, 0, 1, 1], [], []>} : vector<8x16xbf16>, vector<16x128xbf16>, vector<8x128xf32> -> vector<8x128xf32>
    %c0_3 = arith.constant 0 : index
    %c0_4 = arith.constant 0 : index
    %4 = vector.load %arg3[%c0_3, %c0_4] : memref<1x128xf32, #tpu.memory_space<vmem>>, vector<1x128xf32>
    %5 = vector.broadcast %4 : vector<1x128xf32> to vector<8x128xf32>
    %6 = arith.addf %3, %5 : vector<8x128xf32>
    %cst_5 = arith.constant 0.000000e+00 : f32
    %7 = vector.broadcast %cst_5 : f32 to vector<8x128xf32>
    %8 = arith.maximumf %6, %7 : vector<8x128xf32>
    %9 = arith.truncf %8 : vector<8x128xf32> to vector<8x128xbf16>
    %c0_6 = arith.constant 0 : index
    %c0_7 = arith.constant 0 : index
    %10 = vector.load %arg4[%c0_6, %c0_7] : memref<128x128xbf16, #tpu.memory_space<vmem>>, vector<128x128xbf16>
    %cst_8 = arith.constant dense<0.000000e+00> : vector<8x128xf32>
    %11 = tpu.matmul %9, %10, %cst_8 {dimension_numbers = #tpu.dot_dimension_numbers<[1], [0], [0], [1], [0, 0, 1, 1], [], []>} : vector<8x128xbf16>, vector<128x128xbf16>, vector<8x128xf32> -> vector<8x128xf32>
    %c0_9 = arith.constant 0 : index
    %c0_10 = arith.constant 0 : index
    %12 = vector.load %arg5[%c0_9, %c0_10] : memref<1x128xf32, #tpu.memory_space<vmem>>, vector<1x128xf32>
    %13 = vector.broadcast %12 : vector<1x128xf32> to vector<8x128xf32>
    %14 = arith.addf %11, %13 : vector<8x128xf32>
    %cst_11 = arith.constant 0.000000e+00 : f32
    %15 = vector.broadcast %cst_11 : f32 to vector<8x128xf32>
    %16 = arith.maximumf %14, %15 : vector<8x128xf32>
    %17 = arith.truncf %16 : vector<8x128xf32> to vector<8x128xbf16>
    %c0_12 = arith.constant 0 : index
    %c0_13 = arith.constant 0 : index
    %18 = vector.load %arg6[%c0_12, %c0_13] : memref<128x128xbf16, #tpu.memory_space<vmem>>, vector<128x128xbf16>
    %cst_14 = arith.constant dense<0.000000e+00> : vector<8x128xf32>
    %19 = tpu.matmul %17, %18, %cst_14 {dimension_numbers = #tpu.dot_dimension_numbers<[1], [0], [0], [1], [0, 0, 1, 1], [], []>} : vector<8x128xbf16>, vector<128x128xbf16>, vector<8x128xf32> -> vector<8x128xf32>
    %c0_15 = arith.constant 0 : index
    %c0_16 = arith.constant 0 : index
    %20 = vector.load %arg7[%c0_15, %c0_16] : memref<1x128xf32, #tpu.memory_space<vmem>>, vector<1x128xf32>
    %21 = vector.broadcast %20 : vector<1x128xf32> to vector<8x128xf32>
    %22 = arith.addf %19, %21 : vector<8x128xf32>
    %cst_17 = arith.constant dense<0xFF800000> : vector<8xf32>
    %23 = vector.multi_reduction <maximumf>, %22, %cst_17 [1] : vector<8x128xf32> to vector<8xf32>
    %24 = vector.shape_cast %23 : vector<8xf32> to vector<8x1xf32>
    %25 = vector.broadcast %24 : vector<8x1xf32> to vector<8x128xf32>
    %26 = arith.subf %22, %25 : vector<8x128xf32>
    %27 = math.exp %26 : vector<8x128xf32>
    %cst_18 = arith.constant dense<0.000000e+00> : vector<8xf32>
    %28 = vector.multi_reduction <add>, %27, %cst_18 [1] : vector<8x128xf32> to vector<8xf32>
    %29 = vector.shape_cast %28 : vector<8xf32> to vector<8x1xf32>
    %30 = vector.broadcast %29 : vector<8x1xf32> to vector<8x128xf32>
    %31 = arith.divf %27, %30 : vector<8x128xf32>
    %32 = arith.truncf %31 : vector<8x128xf32> to vector<8x128xbf16>
    %c0_19 = arith.constant 0 : index
    %c0_20 = arith.constant 0 : index
    %33 = vector.load %arg8[%c0_19, %c0_20] : memref<8x128xbf16, #tpu.memory_space<vmem>>, vector<8x128xbf16>
    tpu.vector_store %arg8[%c0_19, %c0_20], %32 {strides = array<i32>} : memref<8x128xbf16, #tpu.memory_space<vmem>>, vector<8x128xbf16>,
    return
  }
  func.func @transform_0(%arg0: i32) -> (i32, i32) {
    %c0_i32 = arith.constant 0 : i32
    %c0_i32_0 = arith.constant 0 : i32
    return %arg0, %c0_i32 : i32, i32
  }
  func.func @transform_1(%arg0: i32) -> (i32, i32) {
    %c0_i32 = arith.constant 0 : i32
    %c0_i32_0 = arith.constant 0 : i32
    %c0_i32_1 = arith.constant 0 : i32
    return %c0_i32, %c0_i32_0 : i32, i32
  }
  func.func @transform_2(%arg0: i32) -> (i32, i32) {
    %c0_i32 = arith.constant 0 : i32
    %c0_i32_0 = arith.constant 0 : i32
    %c0_i32_1 = arith.constant 0 : i32
    return %c0_i32, %c0_i32_0 : i32, i32
  }
  func.func @transform_3(%arg0: i32) -> (i32, i32) {
    %c0_i32 = arith.constant 0 : i32
    %c0_i32_0 = arith.constant 0 : i32
    %c0_i32_1 = arith.constant 0 : i32
    return %c0_i32, %c0_i32_0 : i32, i32
  }
  func.func @transform_4(%arg0: i32) -> (i32, i32) {
    %c0_i32 = arith.constant 0 : i32
    %c0_i32_0 = arith.constant 0 : i32
    %c0_i32_1 = arith.constant 0 : i32
    return %c0_i32, %c0_i32_0 : i32, i32
  }
  func.func @transform_5(%arg0: i32) -> (i32, i32) {
    %c0_i32 = arith.constant 0 : i32
    %c0_i32_0 = arith.constant 0 : i32
    %c0_i32_1 = arith.constant 0 : i32
    return %c0_i32, %c0_i32_0 : i32, i32
  }
  func.func @transform_6(%arg0: i32) -> (i32, i32) {
    %c0_i32 = arith.constant 0 : i32
    %c0_i32_0 = arith.constant 0 : i32
    %c0_i32_1 = arith.constant 0 : i32
    return %c0_i32, %c0_i32_0 : i32, i32
  }
  func.func @transform_7(%arg0: i32) -> (i32, i32) {
    %c0_i32 = arith.constant 0 : i32
    %c0_i32_0 = arith.constant 0 : i32
    return %arg0, %c0_i32 : i32, i32
  }
}

</mosaic_0001>

<bundles_post_ra>
// kernel: tpu_custom_call.1
= control target key start
LH: loop header
LB: loop body
LE: loop exit
PB: predicated region body
PF: predicated region fallthrough
CT: control target
= control target key end

     0   :  { %12 = vsyncpa [#allocation3], 0  ;;  %s778_s0 = inlined_call_operand.hbm [shape: f32[8,16], index: 0, kind: input, shape index: {}]   ;;  %s779_s1 = inlined_call_operand.hbm [shape: bf16[16,128], index: 1, kind: input, shape index: {}]   ;;  %s780_s2 = inlined_call_operand.vmem [shape: f32[1,128], index: 2, kind: input, shape index: {}]   ;;  %s781_s3 = inlined_call_operand.hbm [shape: bf16[128,128], index: 3, kind: input, shape index: {}]   ;;  %s782_s4 = inlined_call_operand.vmem [shape: f32[1,128], index: 4, kind: input, shape index: {}]   ;;  %s783_s5 = inlined_call_operand.hbm [shape: bf16[128,128], index: 5, kind: input, shape index: {}]   ;;  %s784_s6 = inlined_call_operand.vmem [shape: f32[1,128], index: 6, kind: input, shape index: {}]   ;;  %s785_s7 = inlined_call_operand.hbm [shape: bf16[8,128], index: 7, kind: output, shape index: {}]  }
   0x1   :  { %13 = vsyncpa [#allocation6], 0 }
   0x2   :  { %14 = vsyncpa [#allocation9], 0 }
   0x3   :  { %15 = vsyncpa [#allocation4], 0  ;;  %s631_s24 = smov [#allocation5]   ;;  %s513_s28 = scalar_lea.hbm %s779_s1, 128 }
   0x4   :  { %s31_s25 = sshll.u32 %s631_s24, 4  ;;  %p514_p0 = scmp.ne.s32.totalorder %s779_s1, %s513_s28  ;;  %s32_s25 = int_to_ptr.vmem [resolvable:$true] %s31_s25 }
   0x5   :  { %p517_p1 = scmp.lt.u32.totalorder %s513_s28, %s779_s1 }
   0x7   :  { %p519_p2 = pnand %p517_p1, %p514_p0 }
   0x9   :  { %522 = shalt.err (!%p519_p2)
}
   0xa   :  { %s523_s10 = scalar_lea.vmem %s32_s25, 128  ;;  %p528_p4 = scmp.lt.s32.totalorder %s32_s25, %s32_s25 }
   0xb   :  { %p524_p3 = scmp.ne.s32.totalorder %s32_s25, %s523_s10  ;;  %p529_p5 = scmp.lt.s32.totalorder %s523_s10, %s523_s10 }
   0xd   :  { %p530_p6 = por %p529_p5, %p528_p4 }
   0xf   :  { %p531_p7 = pnand %p530_p6, %p524_p3 }
  0x11   :  { %534 = shalt.err (!%p531_p7)
}
  0x12   :  { %s632_s11 = smov 64   ;;  %s633_s12 = smov 4  }
  0x13   :  { %37 = dma.hbm_to_vmem [thread:$0]  %s779_s1, 128, %s32_s25, [#allocation6], %s632_s11, %s632_s11, %s633_s12  }
  0x14   :  { %s634_s15 = smov [#allocation2]   ;;  %s635_s17 = smov [#allocation7]  }
  0x15   :  { %s22_s16 = sshll.u32 %s634_s15, 4  ;;  %s45_s18 = sshll.u32 %s635_s17, 4  ;;  %s23_s16 = int_to_ptr.vmem [resolvable:$true] %s22_s16  ;;  %s46_s18 = int_to_ptr.vmem [resolvable:$true] %s45_s18 }
  0x16   :  { %s535_s21 = scalar_lea.hbm %s778_s0, 128 }
  0x17   :  { %p536_p8 = scmp.ne.s32.totalorder %s778_s0, %s535_s21  ;;  %p539_p9 = scmp.lt.u32.totalorder %s535_s21, %s778_s0 }
  0x19   :  { %p541_p10 = pnand %p539_p9, %p536_p8 }
  0x1b   :  { %544 = shalt.err (!%p541_p10)
}
  0x1c   :  { %s545_s1 = scalar_lea.vmem %s23_s16, 128  ;;  %p550_p12 = scmp.lt.s32.totalorder %s23_s16, %s23_s16 }
  0x1d   :  { %p546_p11 = scmp.ne.s32.totalorder %s23_s16, %s545_s1  ;;  %p551_p13 = scmp.lt.s32.totalorder %s545_s1, %s545_s1 }
  0x1f   :  { %p552_p0 = por %p551_p13, %p550_p12 }
  0x21   :  { %p553_p1 = pnand %p552_p0, %p546_p11 }
  0x23   :  { %556 = shalt.err (!%p553_p1)
}
  0x24   :  { %25 = dma.hbm_to_vmem [thread:$0]  %s778_s0, 128, %s23_s16, [#allocation3]  }
  0x25   :  { %s557_s30 = scalar_lea.hbm %s781_s3, 1024 }
  0x26   :  { %p558_p2 = scmp.ne.s32.totalorder %s781_s3, %s557_s30  ;;  %p561_p3 = scmp.lt.u32.totalorder %s557_s30, %s781_s3 }
  0x28   :  { %p563_p4 = pnand %p561_p3, %p558_p2 }
  0x2a   :  { %566 = shalt.err (!%p563_p4)
}
  0x2b   :  { %s567_s14 = scalar_lea.vmem %s46_s18, 1024  ;;  %p572_p6 = scmp.lt.s32.totalorder %s46_s18, %s46_s18 }
  0x2c   :  { %p568_p5 = scmp.ne.s32.totalorder %s46_s18, %s567_s14  ;;  %p573_p7 = scmp.lt.s32.totalorder %s567_s14, %s567_s14 }
  0x2e   :  { %p574_p8 = por %p573_p7, %p572_p6 }
  0x30   :  { %p575_p9 = pnand %p574_p8, %p568_p5 }
  0x32   :  { %578 = shalt.err (!%p575_p9)
}
  0x33   :  { %51 = dma.hbm_to_vmem [thread:$0]  %s781_s3, 1024, %s46_s18, [#allocation6], %s632_s11, %s632_s11, %s633_s12  }
  0x34   :  { %s636_s16 = smov [#allocation8]   ;;  %s579_s21 = scalar_lea.hbm %s783_s5, 1024 }
  0x35   :  { %s59_s17 = sshll.u32 %s636_s16, 4  ;;  %p580_p10 = scmp.ne.s32.totalorder %s783_s5, %s579_s21  ;;  %s60_s17 = int_to_ptr.vmem [resolvable:$true] %s59_s17 }
  0x36   :  { %p583_p11 = scmp.lt.u32.totalorder %s579_s21, %s783_s5 }
  0x38   :  { %p585_p12 = pnand %p583_p11, %p580_p10 }
  0x3a   :  { %588 = shalt.err (!%p585_p12)
}
  0x3b   :  { %s589_s1 = scalar_lea.vmem %s60_s17, 1024  ;;  %p594_p0 = scmp.lt.s32.totalorder %s60_s17, %s60_s17 }
  0x3c   :  { %p590_p13 = scmp.ne.s32.totalorder %s60_s17, %s589_s1  ;;  %p595_p1 = scmp.lt.s32.totalorder %s589_s1, %s589_s1 }
  0x3e   :  { %p596_p2 = por %p595_p1, %p594_p0 }
  0x40   :  { %p597_p3 = pnand %p596_p2, %p590_p13 }
  0x42   :  { %600 = shalt.err (!%p597_p3)
}
  0x43   :  { %65 = dma.hbm_to_vmem [thread:$0]  %s783_s5, 1024, %s60_s17, [#allocation9], %s632_s11, %s632_s11, %s633_s12  }
  0x44   :  { %623 = dma.done.wait [#allocation3], 128  }
  0x45   :  { %624 = vsyncadd [#allocation3], 4294967168 }
  0x46   :  { %625 = dma.done.wait [#allocation6], 1152  }
  0x47   :  { %626 = vsyncadd [#allocation6], 4294966144 }
  0x48   :  { %627 = dma.done.wait [#allocation9], 1024  }
  0x49   :  { %628 = vsyncadd [#allocation9], 4294966272  ;;  %v637_v0 = vmov 0.0   ;;  %vm638_vm0 = vmmov 0   ;;  %v492_v1 = vld [vmem:[#allocation5] sm:$0xff]   ;;  %v81_v2 = vld [vmem:[#allocation2] sm:$0xff] }
  0x4a   :  { %437 = vmatprep.subr.bf16.mxu0 %v637_v0  ;;  %439 = vmatprep.mubr.msk.bf16.mxu0 %vm638_vm0, %v637_v0  ;;  %v82_v3 = vpack.c.bf16 %v81_v2, %v81_v2  ;;  %vm98_vm1 = vcmask 130048   ;;  %v493_v4 = vld [vmem:[#allocation7] sm:$0xff]   ;;  %v494_v5 = vld [vmem:[#allocation7 + $0x8] sm:$0xff]   ;;  %v495_v6 = vld [vmem:[#allocation7 + $0x10] sm:$0xff]  }
  0x4b   :  { %443 = vmatprep.subr.bf16.mxu1 %v637_v0  ;;  %459 = vmatprep.mubr.msk.bf16.mxu1 %vm638_vm0, %v637_v0  ;;  %v496_v7 = vld [vmem:[#allocation7 + $0x18] sm:$0xff]   ;;  %v497_v8 = vld [vmem:[#allocation7 + $0x20] sm:$0xff]   ;;  %v498_v9 = vld [vmem:[#allocation7 + $0x28] sm:$0xff]  }
  0x4c   :  { %438 = vmatpush3.bf16.msra.mxu0 %v492_v1  ;;  %444 = vmatpush3.bf16.msra.mxu1 %v493_v4  ;;  %v499_v10 = vld [vmem:[#allocation7 + $0x30] sm:$0xff]   ;;  %v500_v11 = vld [vmem:[#allocation7 + $0x38] sm:$0xff]   ;;  %v501_v12 = vld [vmem:[#allocation8] sm:$0xff]  }
  0x4d   :  { %463 = vmatprep.subr.bf16.mxu0 %v637_v0  ;;  %445 = vmatprep.subr.bf16.mxu1 %v637_v0  ;;  %v502_v13 = vld [vmem:[#allocation8 + $0x8] sm:$0xff]   ;;  %v503_v14 = vld [vmem:[#allocation8 + $0x10] sm:$0xff]   ;;  %v504_v15 = vld [vmem:[#allocation8 + $0x18] sm:$0xff]  }
  0x4e   :  { %v505_v16 = vld [vmem:[#allocation8 + $0x20] sm:$0xff]   ;;  %v506_v17 = vld [vmem:[#allocation8 + $0x28] sm:$0xff]   ;;  %v396_v18 = vld [vmem:[%s780_s2] ss:$0 sm:$0xff] }
  0x4f   :  { %440 = vmatmul.mubr.msk.bf16.vlgmr.msra.gmra.mrb[0].mxu0 %vm98_vm1, %v82_v3  ;;  %v507_v26 = vld [vmem:[#allocation8 + $0x30] sm:$0xff]   ;;  %v508_v27 = vld [vmem:[#allocation8 + $0x38] sm:$0xff]  }
  0x50   :  { %479 = vmatprep.mubr.msk.bf16.mxu0 %vm638_vm0, %v637_v0  ;;  %446 = vmatpush3.bf16.msra.mxu1 %v494_v5  ;;  %v399_v28 = vld [vmem:[%s782_s4] ss:$0 sm:$0xff]  ;;  %s639_s4 = smov [#allocation10]  }
  0x51   :  { %447 = vmatprep.subr.bf16.mxu1 %v637_v0  ;;  %464 = vmatpush3.bf16.msra.mxu0 %v501_v12  ;;  %v408_v36 = vld [vmem:[%s784_s6] ss:$0 sm:$0xff]  ;;  %s385_s28 = sshll.u32 %s639_s4, 4  ;;  %s386_s28 = int_to_ptr.vmem [resolvable:$true] %s385_s28 }
  0x52   :  { %465 = vmatprep.subr.bf16.mxu0 %v637_v0  ;;  %s601_s6 = scalar_lea.vmem %s386_s28, 64  ;;  %p606_p5 = scmp.lt.s32.totalorder %s386_s28, %s386_s28 }
  0x53   :  { %p602_p4 = scmp.ne.s32.totalorder %s386_s28, %s601_s6  ;;  %p607_p6 = scmp.lt.s32.totalorder %s601_s6, %s601_s6 }
  0x54   :  { %448 = vmatpush3.bf16.msra.mxu1 %v495_v6 }
  0x55   :  { %449 = vmatprep.subr.bf16.mxu1 %v637_v0  ;;  %466 = vmatpush3.bf16.msra.mxu0 %v502_v13  ;;  %p608_p7 = por %p607_p6, %p606_p5 }
  0x56   :  { %467 = vmatprep.subr.bf16.mxu0 %v637_v0 }
  0x57   :  { %p609_p8 = pnand %p608_p7, %p602_p4 }
  0x58   :  { %450 = vmatpush3.bf16.msra.mxu1 %v496_v7 }
  0x59   :  { %451 = vmatprep.subr.bf16.mxu1 %v637_v0  ;;  %468 = vmatpush3.bf16.msra.mxu0 %v503_v14 }
  0x5a   :  { %469 = vmatprep.subr.bf16.mxu0 %v637_v0 }
  0x5c   :  { %452 = vmatpush3.bf16.msra.mxu1 %v497_v8 }
  0x5d   :  { %453 = vmatprep.subr.bf16.mxu1 %v637_v0  ;;  %470 = vmatpush3.bf16.msra.mxu0 %v504_v15 }
  0x5e   :  { %471 = vmatprep.subr.bf16.mxu0 %v637_v0 }
  0x60   :  { %454 = vmatpush3.bf16.msra.mxu1 %v498_v9 }
  0x61   :  { %455 = vmatprep.subr.bf16.mxu1 %v637_v0  ;;  %472 = vmatpush3.bf16.msra.mxu0 %v505_v16 }
  0x62   :  { %473 = vmatprep.subr.bf16.mxu0 %v637_v0 }
  0x64   :  { %456 = vmatpush3.bf16.msra.mxu1 %v499_v10 }
  0x65   :  { %457 = vmatprep.subr.bf16.mxu1 %v637_v0  ;;  %474 = vmatpush3.bf16.msra.mxu0 %v506_v17 }
  0x66   :  { %475 = vmatprep.subr.bf16.mxu0 %v637_v0 }
  0x68   :  { %458 = vmatpush3.bf16.msra.mxu1 %v500_v11 }
  0x69   :  { %476 = vmatpush3.bf16.msra.mxu0 %v507_v26 }
  0x6a   :  { %477 = vmatprep.subr.bf16.mxu0 %v637_v0 }
  0x6d   :  { %478 = vmatpush3.bf16.msra.mxu0 %v508_v27 }
 0x122   :  { %v136_v19 = vpop.f32.mrb[0].mxu0 }
 0x123   :  { %v137_v20 = vadd.f32 %v396_v18, %v136_v19  ;;  %v441_v21 = vpop.f32.mrb[1].mxu0 }
 0x124   :  { %v139_v22 = vpop.f32.mrb[2].mxu0 }
 0x125   :  { %v142_v23 = vmax.f32 %v137_v20, 0.0  ;;  %v442_v24 = vpop.f32.mrb[3].mxu0 }
 0x127   :  { %v143_v25 = vpack.c.bf16 %v142_v23, %v142_v23 }
 0x129   :  { %460 = vmatmul.mubr.bf16.vlgmr.msra.gmra.mrb[0].mxu1 %v143_v25 }
 0x1fc   :  { %v249_v29 = vpop.f32.mrb[0].mxu1 }
 0x1fd   :  { %v250_v30 = vadd.f32 %v399_v28, %v249_v29  ;;  %v461_v31 = vpop.f32.mrb[1].mxu1 }
 0x1fe   :  { %v252_v32 = vpop.f32.mrb[2].mxu1 }
 0x1ff   :  { %v255_v33 = vmax.f32 %v250_v30, 0.0  ;;  %v462_v34 = vpop.f32.mrb[3].mxu1 }
 0x201   :  { %v256_v35 = vpack.c.bf16 %v255_v33, %v255_v33 }
 0x203   :  { %480 = vmatmul.mubr.bf16.vlgmr.msra.gmra.mrb[4].mxu0 %v256_v35 }
 0x2d6   :  { %v362_v37 = vpop.f32.mrb[4].mxu0 }
 0x2d7   :  { %v363_v38 = vadd.f32 %v408_v36, %v362_v37  ;;  %v481_v39 = vpop.f32.mrb[5].mxu0 }
 0x2d8   :  { %v365_v40 = vpop.f32.mrb[6].mxu0 }
 0x2d9   :  { %368 = vmax.xlane.f32.xlu0 %v363_v38  ;;  %v482_v41 = vpop.f32.mrb[7].mxu0 }
 0x366   :  { %v369_v42 = vpop.xlane.xlu0 %368 }
 0x367   :  { %v370_v43 = vsub.f32 %v363_v38, %v369_v42 }
 0x369   :  { %v371_v44 = vmul.f32 1.442695, %v370_v43 }
 0x36b   :  { %509 = vpow2.f32 %v371_v44 }
 0x375   :  { %v510_v45 = vpop.eup %509 }
 0x376   :  { %373 = vadd.xlane.f32.xlu0 %v510_v45 }
 0x403   :  { %v374_v46 = vpop.xlane.xlu0 %373 }
 0x404   :  { %511 = vrcp.f32 %v374_v46 }
 0x40e   :  { %v512_v47 = vpop.eup %511 }
 0x40f   :  { %v376_v48 = vmul.f32 %v512_v47, %v510_v45 }
 0x411   :  { %v377_v49 = vpack.c.bf16 %v376_v48, %v376_v48 }
 0x413   :  { %378 = vst [vmem:[#allocation10] sm:$0xf] %v377_v49 }
 0x414   :  { %612 = shalt.err (!%p609_p8)
}
 0x415   :  { %s613_s8 = scalar_lea.hbm %s785_s7, 64 }
 0x416   :  { %p614_p9 = scmp.ne.s32.totalorder %s785_s7, %s613_s8  ;;  %p617_p10 = scmp.lt.u32.totalorder %s613_s8, %s785_s7 }
 0x418   :  { %p619_p11 = pnand %p617_p10, %p614_p9 }
 0x41a   :  { %622 = shalt.err (!%p619_p11)
}
 0x41b   :  { %388 = dma.vmem_to_hbm [thread:$0]  %s386_s28, 64, %s785_s7, [#allocation4]  }
 0x41c   :  { %629 = dma.done.wait [#allocation4], 64  }
 0x41d   :  { %630 = vsyncadd [#allocation4], 4294967232 }
 0x41e   :  { %392 = vsyncpa [#allocation3], 1 }
 0x41f   :  { %393 = vsyncpa [#allocation6], 1 }
 0x420   :  { %394 = vsyncpa [#allocation9], 1 }
 0x421   :  { %395 = vsyncpa [#allocation4], 1 }

</bundles_post_ra>
